<compile_context>
chip_gen: v7x
topology: tpu7x:2x2x1
jax: 0.10.0
libtpu: 0.0.40
codegen_flags: <defaults>
</compile_context>

<pallas_src>
import functools

import jax
import jax.numpy as jnp
from jax.experimental import pallas as pl
from jax.experimental.pallas import tpu as pltpu

# ---- fused network dimensions (architecture fixed at the module default 256/128/64) ----
H0 = 512                        # 2 * 256  (actor | critic layer 0, concatenated)
H1 = 256                        # 2 * 128  (block-diagonal layer 1)
H2 = 128                        # 2 * 64   (block-diagonal layer 2)
HEAD = 128                      # lane-dense head: col0=alpha, col1=beta, col2=v, rest 0
B_OFF0, B_OFF1, B_OFF2, B_OFF3 = 0, H0, H0 + H1, H0 + H1 + H2
B_TOTAL = H0 + H1 + H2 + HEAD   # 1024  (one packed bias slab)


def _round_up(n, m):
    return ((n + m - 1) // m) * m


# --------------------------------------------------------------------------------------
# Kernel
# --------------------------------------------------------------------------------------
def actor_critic_kernel(x_ref, w0_ref, w1_ref, w2_ref, w3_ref, b_ref, out_ref,
                        *, output_dim: int):
    """One batch tile: x (TB, D) f32 -> out (TB, 128) bf16 (alpha|beta|v|zeros)."""
    # In-kernel cast to bf16 (cheap VPU op) instead of a wrapper-side HBM pad/cast pass.
    x = x_ref[...].astype(jnp.bfloat16)                              # (TB, D) bf16

    # Fused actor+critic layer 0 (bf16 operands, f32 accumulation on the MXU).
    h = jnp.dot(x, w0_ref[...], preferred_element_type=jnp.float32)
    h = jnp.maximum(h + b_ref[:, B_OFF0:B_OFF0 + H0], 0.0)          # (TB, 512) f32

    # Block-diagonal layer 1.
    h = jnp.dot(h.astype(jnp.bfloat16), w1_ref[...],
                preferred_element_type=jnp.float32)
    h = jnp.maximum(h + b_ref[:, B_OFF1:B_OFF1 + H1], 0.0)          # (TB, 256) f32

    # Block-diagonal layer 2.
    h = jnp.dot(h.astype(jnp.bfloat16), w2_ref[...],
                preferred_element_type=jnp.float32)
    h = jnp.maximum(h + b_ref[:, B_OFF2:B_OFF2 + H2], 0.0)          # (TB, 128) f32

    # Fused heads: alpha / beta from actor half, v from critic half.
    y = jnp.dot(h.astype(jnp.bfloat16), w3_ref[...],
                preferred_element_type=jnp.float32)
    y = y + b_ref[:, B_OFF3:B_OFF3 + HEAD]                          # (TB, 128) f32

    # Epilogue in f32: softplus(.)+1 on alpha/beta lanes, identity on the v lane,
    # zeros elsewhere.  Softplus matches torch.nn.Softplus(beta=1, threshold=20).
    lane = jax.lax.broadcasted_iota(jnp.int32, y.shape, dimension=1)
    sp = jnp.where(y > 20.0, y, jnp.log1p(jnp.exp(jnp.minimum(y, 20.0)))) + 1.0
    out = jnp.where(lane < 2 * output_dim, sp, y)
    out = jnp.where(lane <= 2 * output_dim, out, 0.0)
    out_ref[...] = out.astype(out_ref.dtype)                        # bf16 lane-dense slab


# --------------------------------------------------------------------------------------
# Parameter construction / packing
# --------------------------------------------------------------------------------------
def init_linear(key, fan_in, fan_out):
    """Deterministic init, (in, out) weight layout + (1, out) bias (torch Linear W.T)."""
    kw, kb = jax.random.split(key)
    bound = 1.0 / jnp.sqrt(jnp.float32(fan_in))
    w = jax.random.uniform(kw, (fan_in, fan_out), jnp.float32, -bound, bound)
    b = jax.random.uniform(kb, (1, fan_out), jnp.float32, -bound, bound)
    return w, b


def make_params(key, in_dim, architecture=(256, 128, 64), output_dim=1):
    keys = jax.random.split(key, 11)
    a_w0, a_b0 = init_linear(keys[0], in_dim, architecture[0])
    a_w1, a_b1 = init_linear(keys[1], architecture[0], architecture[1])
    a_w2, a_b2 = init_linear(keys[2], architecture[1], architecture[2])
    alpha_w, alpha_b = init_linear(keys[3], architecture[2], output_dim)
    beta_w, beta_b = init_linear(keys[4], architecture[2], output_dim)
    c_w0, c_b0 = init_linear(keys[5], in_dim, architecture[0])
    c_w1, c_b1 = init_linear(keys[6], architecture[0], architecture[1])
    c_w2, c_b2 = init_linear(keys[7], architecture[1], architecture[2])
    v_w, v_b = init_linear(keys[8], architecture[2], 1)
    return (a_w0, a_b0, a_w1, a_b1, a_w2, a_b2,
            alpha_w, alpha_b, beta_w, beta_b,
            c_w0, c_b0, c_w1, c_b1, c_w2, c_b2,
            v_w, v_b)


def pack_params(params, output_dim=1):
    """Pack 18 per-layer params into 4 bf16 weight slabs + 1 f32 bias slab."""
    (a_w0, a_b0, a_w1, a_b1, a_w2, a_b2,
     alpha_w, alpha_b, beta_w, beta_b,
     c_w0, c_b0, c_w1, c_b1, c_w2, c_b2,
     v_w, v_b) = params

    d = a_w0.shape[0]
    h0, h1, h2 = a_w0.shape[1], a_w1.shape[1], a_w2.shape[1]
    assert (2 * h0, 2 * h1, 2 * h2) == (H0, H1, H2), "architecture must be (256,128,64)"
    od = output_dim
    assert 2 * od + 1 <= HEAD

    # Layer 0: actor and critic share the full input -> simple concat along columns.
    w0 = jnp.concatenate([a_w0, c_w0], axis=1)                      # (d, 512)

    w1 = jnp.zeros((H0, H1), jnp.float32)
    w1 = w1.at[:h0, :h1].set(a_w1).at[h0:, h1:].set(c_w1)

    w2 = jnp.zeros((H1, H2), jnp.float32)
    w2 = w2.at[:h1, :h2].set(a_w2).at[h1:, h2:].set(c_w2)

    w3 = jnp.zeros((H2, HEAD), jnp.float32)
    w3 = w3.at[:h2, 0:od].set(alpha_w).at[:h2, od:2 * od].set(beta_w)
    w3 = w3.at[h2:, 2 * od:2 * od + 1].set(v_w)

    b = jnp.zeros((1, B_TOTAL), jnp.float32)
    b = b.at[:, B_OFF0:B_OFF0 + h0].set(a_b0).at[:, B_OFF0 + h0:B_OFF0 + 2 * h0].set(c_b0)
    b = b.at[:, B_OFF1:B_OFF1 + h1].set(a_b1).at[:, B_OFF1 + h1:B_OFF1 + 2 * h1].set(c_b1)
    b = b.at[:, B_OFF2:B_OFF2 + h2].set(a_b2).at[:, B_OFF2 + h2:B_OFF2 + 2 * h2].set(c_b2)
    b = b.at[:, B_OFF3:B_OFF3 + od].set(alpha_b)
    b = b.at[:, B_OFF3 + od:B_OFF3 + 2 * od].set(beta_b)
    b = b.at[:, B_OFF3 + 2 * od:B_OFF3 + 2 * od + 1].set(v_b)

    return (w0.astype(jnp.bfloat16), w1.astype(jnp.bfloat16),
            w2.astype(jnp.bfloat16), w3.astype(jnp.bfloat16), b)


# --------------------------------------------------------------------------------------
# Wrapper
# --------------------------------------------------------------------------------------
def actor_critic_forward(x, packed_params, output_dim=1, tile_b=1024,
                         out_dtype=jnp.bfloat16):
    """x: (B, state_stack, input_dim) or (B, D).  Returns ((alpha, beta), v) in f32."""
    w0, w1, w2, w3, biases = packed_params
    B = x.shape[0]
    x_flat = x.reshape(B, -1).astype(jnp.float32)        # matches torch x.view(B, -1)
    d = x_flat.shape[1]
    assert w0.shape[0] == d, "packed w0 does not match flattened input dim"

    # Batch tile: as large as possible (amortizes ~0.35us/step grid overhead and feeds
    # the 256-wide MXU a big M), but guarantee >= 2 grid steps whenever the batch allows
    # so the "parallel" axis actually splits across both v7x TensorCores.
    tb = min(tile_b, _round_up(B, 8))
    if B >= 16:
        tb = min(tb, _round_up((B + 1) // 2, 8))
    b_pad = _round_up(B, tb)
    if b_pad != B:
        # Batch-only padding (no K pad / no dtype cast pass); skipped when B % tb == 0.
        x_flat = jnp.pad(x_flat, ((0, b_pad - B), (0, 0)))

    grid = (b_pad // tb,)
    flops = 2 * b_pad * (d * H0 + H0 * H1 + H1 * H2 + H2 * HEAD)
    bytes_accessed = (b_pad * d * 4
                      + (w0.size + w1.size + w2.size + w3.size) * 2
                      + biases.size * 4
                      + b_pad * HEAD * jnp.dtype(out_dtype).itemsize)

    kernel = functools.partial(actor_critic_kernel, output_dim=output_dim)

    out = pl.pallas_call(
        kernel,
        out_shape=jax.ShapeDtypeStruct((b_pad, HEAD), out_dtype),
        grid_spec=pltpu.PrefetchScalarGridSpec(
            num_scalar_prefetch=0,
            grid=grid,
            in_specs=[
                # x: batch-tiled; last block dim == full array dim (44), Mosaic pads K.
                pl.BlockSpec((tb, d), lambda i: (i, 0)),
                # Weights / biases: VMEM-resident across the grid (constant index_map).
                pl.BlockSpec((d, H0), lambda i: (0, 0)),
                pl.BlockSpec((H0, H1), lambda i: (0, 0)),
                pl.BlockSpec((H1, H2), lambda i: (0, 0)),
                pl.BlockSpec((H2, HEAD), lambda i: (0, 0)),
                pl.BlockSpec((1, B_TOTAL), lambda i: (0, 0)),
            ],
            out_specs=pl.BlockSpec((tb, HEAD), lambda i: (i, 0)),
        ),
        compiler_params=pltpu.CompilerParams(
            dimension_semantics=("parallel",),
            vmem_limit_bytes=32 * 1024 * 1024,   # plenty for tile_b<=2048 on all gens
        ),
        cost_estimate=pl.CostEstimate(
            flops=flops,
            transcendentals=2 * b_pad * HEAD,
            bytes_accessed=bytes_accessed,
        ),
    )(x_flat, w0, w1, w2, w3, biases)

    # One narrow slice over the slab (instead of 3 strided passes), then cheap splits.
    y = out[:B, :2 * output_dim + 1].astype(jnp.float32)
    alpha = y[:, 0:output_dim]
    beta = y[:, output_dim:2 * output_dim]
    v = y[:, 2 * output_dim:2 * output_dim + 1]
    return (alpha, beta), v


# --------------------------------------------------------------------------------------
# Pure-JAX reference (same bf16-operand / f32-accumulation recipe) for verification
# --------------------------------------------------------------------------------------
def reference_forward(x, params, output_dim=1):
    (a_w0, a_b0, a_w1, a_b1, a_w2, a_b2,
     alpha_w, alpha_b, beta_w, beta_b,
     c_w0, c_b0, c_w1, c_b1, c_w2, c_b2,
     v_w, v_b) = params

    def bdot(a, w):
        return jnp.dot(a.astype(jnp.bfloat16), w.astype(jnp.bfloat16),
                       preferred_element_type=jnp.float32)

    def base(h, w0, b0, w1, b1, w2, b2):
        h = jnp.maximum(bdot(h, w0) + b0, 0.0)
        h = jnp.maximum(bdot(h, w1) + b1, 0.0)
        h = jnp.maximum(bdot(h, w2) + b2, 0.0)
        return h

    def softplus(z):
        return jnp.where(z > 20.0, z, jnp.log1p(jnp.exp(jnp.minimum(z, 20.0))))

    B = x.shape[0]
    xf = x.reshape(B, -1).astype(jnp.float32)
    ha = base(xf, a_w0, a_b0, a_w1, a_b1, a_w2, a_b2)
    alpha = softplus(bdot(ha, alpha_w) + alpha_b) + 1.0
    beta = softplus(bdot(ha, beta_w) + beta_b) + 1.0
    hc = base(xf, c_w0, c_b0, c_w1, c_b1, c_w2, c_b2)
    v = bdot(hc, v_w) + v_b
    return (alpha, beta), v


# --------------------------------------------------------------------------------------
if __name__ == "__main__":
    # Module defaults: state_stack=4, input_dim=11 -> flattened feature dim 44.
    state_stack, input_dim = 4, 11
    architecture = (256, 128, 64)
    output_dim = 1

    key = jax.random.PRNGKey(0)
    kx, kp, kx2 = jax.random.split(key, 3)
    params = make_params(kp, state_stack * input_dim, architecture, output_dim)
    packed = pack_params(params, output_dim)

    # --- small batch (single tile, grid=1) ---
    B = 8
    x = jax.random.normal(kx, (B, state_stack, input_dim), dtype=jnp.float32)
    (alpha, beta), v = actor_critic_forward(x, packed, output_dim)
    jax.block_until_ready((alpha, beta, v))

    assert alpha.shape == (B, output_dim)
    assert beta.shape == (B, output_dim)
    assert v.shape == (B, 1)
    # alpha/beta are softplus(.)+1 so must be >= 1 (bf16 output slab, hence >=).
    assert bool(jnp.all(alpha >= 1.0)) and bool(jnp.all(beta >= 1.0))

    (alpha_r, beta_r), v_r = reference_forward(x, params, output_dim)
    assert bool(jnp.allclose(alpha, alpha_r, rtol=1e-2, atol=1e-2))
    assert bool(jnp.allclose(beta, beta_r, rtol=1e-2, atol=1e-2))
    assert bool(jnp.allclose(v, v_r, rtol=1e-2, atol=1e-2))

    # --- medium batch: exercises the multi-tile grid (>=2 steps) + batch-padding path ---
    B2 = 1000
    x2 = jax.random.normal(kx2, (B2, state_stack, input_dim), dtype=jnp.float32)
    (alpha2, beta2), v2 = actor_critic_forward(x2, packed, output_dim)
    jax.block_until_ready((alpha2, beta2, v2))
    assert alpha2.shape == (B2, output_dim) and v2.shape == (B2, 1)

    (alpha2_r, beta2_r), v2_r = reference_forward(x2, params, output_dim)
    assert bool(jnp.allclose(alpha2, alpha2_r, rtol=1e-2, atol=1e-2))
    assert bool(jnp.allclose(beta2, beta2_r, rtol=1e-2, atol=1e-2))
    assert bool(jnp.allclose(v2, v2_r, rtol=1e-2, atol=1e-2))

    print("KERNEL_OK")
</pallas_src>

<mosaic_0001>
module attributes {stable_mosaic.version = 11 : i64} {
  func.func @actor_critic_kernel(%arg0: i32, %arg1: memref<8x44xf32, #tpu.memory_space<vmem>>, %arg2: memref<44x512xbf16, #tpu.memory_space<vmem>>, %arg3: memref<512x256xbf16, #tpu.memory_space<vmem>>, %arg4: memref<256x128xbf16, #tpu.memory_space<vmem>>, %arg5: memref<128x128xbf16, #tpu.memory_space<vmem>>, %arg6: memref<1x1024xf32, #tpu.memory_space<vmem>>, %arg7: memref<8x128xbf16, #tpu.memory_space<vmem>>) attributes {dimension_semantics = [#tpu.dimension_semantics<parallel>], iteration_bounds = array<i64: 1>, scalar_prefetch = 0 : i64, scratch_operands = 0 : i64, tpu.core_type = #tpu.core_type<tc>, window_params = [{transform_indices = @transform_0, window_bounds = array<i64: 8, 44>}, {pipeline_mode = #tpu.pipeline_mode<synchronous>, transform_indices = @transform_1, window_bounds = array<i64: 44, 512>}, {pipeline_mode = #tpu.pipeline_mode<synchronous>, transform_indices = @transform_2, window_bounds = array<i64: 512, 256>}, {pipeline_mode = #tpu.pipeline_mode<synchronous>, transform_indices = @transform_3, window_bounds = array<i64: 256, 128>}, {pipeline_mode = #tpu.pipeline_mode<synchronous>, transform_indices = @transform_4, window_bounds = array<i64: 128, 128>}, {pipeline_mode = #tpu.pipeline_mode<synchronous>, transform_indices = @transform_5, window_bounds = array<i64: 1, 1024>}, {transform_indices = @transform_6, window_bounds = array<i64: 8, 128>}]} {
    %c0 = arith.constant 0 : index
    %c0_0 = arith.constant 0 : index
    %0 = vector.load %arg1[%c0, %c0_0] : memref<8x44xf32, #tpu.memory_space<vmem>>, vector<8x44xf32>
    %1 = arith.truncf %0 : vector<8x44xf32> to vector<8x44xbf16>
    %c0_1 = arith.constant 0 : index
    %c0_2 = arith.constant 0 : index
    %2 = vector.load %arg2[%c0_1, %c0_2] : memref<44x512xbf16, #tpu.memory_space<vmem>>, vector<44x512xbf16>
    %cst = arith.constant dense<0.000000e+00> : vector<8x512xf32>
    %3 = tpu.matmul %1, %2, %cst {dimension_numbers = #tpu.dot_dimension_numbers<[1], [0], [0], [1], [0, 0, 1, 1], [], []>} : vector<8x44xbf16>, vector<44x512xbf16>, vector<8x512xf32> -> vector<8x512xf32>
    %c0_3 = arith.constant 0 : index
    %c0_4 = arith.constant 0 : index
    %4 = vector.load %arg6[%c0_3, %c0_4] : memref<1x1024xf32, #tpu.memory_space<vmem>>, vector<1x512xf32>
    %5 = vector.broadcast %4 : vector<1x512xf32> to vector<8x512xf32>
    %6 = arith.addf %3, %5 : vector<8x512xf32>
    %cst_5 = arith.constant 0.000000e+00 : f32
    %7 = vector.broadcast %cst_5 : f32 to vector<8x512xf32>
    %8 = arith.maximumf %6, %7 : vector<8x512xf32>
    %9 = arith.truncf %8 : vector<8x512xf32> to vector<8x512xbf16>
    %c0_6 = arith.constant 0 : index
    %c0_7 = arith.constant 0 : index
    %10 = vector.load %arg3[%c0_6, %c0_7] : memref<512x256xbf16, #tpu.memory_space<vmem>>, vector<512x256xbf16>
    %cst_8 = arith.constant dense<0.000000e+00> : vector<8x256xf32>
    %11 = tpu.matmul %9, %10, %cst_8 {dimension_numbers = #tpu.dot_dimension_numbers<[1], [0], [0], [1], [0, 0, 1, 1], [], []>} : vector<8x512xbf16>, vector<512x256xbf16>, vector<8x256xf32> -> vector<8x256xf32>
    %c0_9 = arith.constant 0 : index
    %c512 = arith.constant 512 : index
    %12 = vector.load %arg6[%c0_9, %c512] : memref<1x1024xf32, #tpu.memory_space<vmem>>, vector<1x256xf32>
    %13 = vector.broadcast %12 : vector<1x256xf32> to vector<8x256xf32>
    %14 = arith.addf %11, %13 : vector<8x256xf32>
    %cst_10 = arith.constant 0.000000e+00 : f32
    %15 = vector.broadcast %cst_10 : f32 to vector<8x256xf32>
    %16 = arith.maximumf %14, %15 : vector<8x256xf32>
    %17 = arith.truncf %16 : vector<8x256xf32> to vector<8x256xbf16>
    %c0_11 = arith.constant 0 : index
    %c0_12 = arith.constant 0 : index
    %18 = vector.load %arg4[%c0_11, %c0_12] : memref<256x128xbf16, #tpu.memory_space<vmem>>, vector<256x128xbf16>
    %cst_13 = arith.constant dense<0.000000e+00> : vector<8x128xf32>
    %19 = tpu.matmul %17, %18, %cst_13 {dimension_numbers = #tpu.dot_dimension_numbers<[1], [0], [0], [1], [0, 0, 1, 1], [], []>} : vector<8x256xbf16>, vector<256x128xbf16>, vector<8x128xf32> -> vector<8x128xf32>
    %c0_14 = arith.constant 0 : index
    %c768 = arith.constant 768 : index
    %20 = vector.load %arg6[%c0_14, %c768] : memref<1x1024xf32, #tpu.memory_space<vmem>>, vector<1x128xf32>
    %21 = vector.broadcast %20 : vector<1x128xf32> to vector<8x128xf32>
    %22 = arith.addf %19, %21 : vector<8x128xf32>
    %cst_15 = arith.constant 0.000000e+00 : f32
    %23 = vector.broadcast %cst_15 : f32 to vector<8x128xf32>
    %24 = arith.maximumf %22, %23 : vector<8x128xf32>
    %25 = arith.truncf %24 : vector<8x128xf32> to vector<8x128xbf16>
    %c0_16 = arith.constant 0 : index
    %c0_17 = arith.constant 0 : index
    %26 = vector.load %arg5[%c0_16, %c0_17] : memref<128x128xbf16, #tpu.memory_space<vmem>>, vector<128x128xbf16>
    %cst_18 = arith.constant dense<0.000000e+00> : vector<8x128xf32>
    %27 = tpu.matmul %25, %26, %cst_18 {dimension_numbers = #tpu.dot_dimension_numbers<[1], [0], [0], [1], [0, 0, 1, 1], [], []>} : vector<8x128xbf16>, vector<128x128xbf16>, vector<8x128xf32> -> vector<8x128xf32>
    %c0_19 = arith.constant 0 : index
    %c896 = arith.constant 896 : index
    %28 = vector.load %arg6[%c0_19, %c896] : memref<1x1024xf32, #tpu.memory_space<vmem>>, vector<1x128xf32>
    %29 = vector.broadcast %28 : vector<1x128xf32> to vector<8x128xf32>
    %30 = arith.addf %27, %29 : vector<8x128xf32>
    %31 = tpu.iota {dimensions = array<i32: 1>} : vector<8x128xi32>
    %cst_20 = arith.constant 2.000000e+01 : f32
    %32 = vector.broadcast %cst_20 : f32 to vector<8x128xf32>
    %33 = arith.cmpf ogt, %30, %32 : vector<8x128xf32>
    %cst_21 = arith.constant 2.000000e+01 : f32
    %34 = vector.broadcast %cst_21 : f32 to vector<8x128xf32>
    %35 = arith.minimumf %30, %34 : vector<8x128xf32>
    %36 = math.exp %35 : vector<8x128xf32>
    %37 = math.log1p %36 : vector<8x128xf32>
    %38 = arith.select %33, %30, %37 : vector<8x128xi1>, vector<8x128xf32>
    %cst_22 = arith.constant 1.000000e+00 : f32
    %39 = vector.broadcast %cst_22 : f32 to vector<8x128xf32>
    %40 = arith.addf %38, %39 : vector<8x128xf32>
    %c2_i32 = arith.constant 2 : i32
    %41 = vector.broadcast %c2_i32 : i32 to vector<8x128xi32>
    %42 = arith.cmpi slt, %31, %41 : vector<8x128xi32>
    %43 = arith.select %42, %40, %30 : vector<8x128xi1>, vector<8x128xf32>
    %c2_i32_23 = arith.constant 2 : i32
    %44 = vector.broadcast %c2_i32_23 : i32 to vector<8x128xi32>
    %45 = arith.cmpi sle, %31, %44 : vector<8x128xi32>
    %cst_24 = arith.constant 0.000000e+00 : f32
    %46 = vector.broadcast %cst_24 : f32 to vector<8x128xf32>
    %47 = arith.select %45, %43, %46 : vector<8x128xi1>, vector<8x128xf32>
    %48 = arith.truncf %47 : vector<8x128xf32> to vector<8x128xbf16>
    %c0_25 = arith.constant 0 : index
    %c0_26 = arith.constant 0 : index
    %49 = vector.load %arg7[%c0_25, %c0_26] : memref<8x128xbf16, #tpu.memory_space<vmem>>, vector<8x128xbf16>
    tpu.vector_store %arg7[%c0_25, %c0_26], %48 {strides = array<i32>} : memref<8x128xbf16, #tpu.memory_space<vmem>>, vector<8x128xbf16>,
    return
  }
  func.func @transform_0(%arg0: i32) -> (i32, i32) {
    %c0_i32 = arith.constant 0 : i32
    %c0_i32_0 = arith.constant 0 : i32
    return %arg0, %c0_i32 : i32, i32
  }
  func.func @transform_1(%arg0: i32) -> (i32, i32) {
    %c0_i32 = arith.constant 0 : i32
    %c0_i32_0 = arith.constant 0 : i32
    %c0_i32_1 = arith.constant 0 : i32
    return %c0_i32, %c0_i32_0 : i32, i32
  }
  func.func @transform_2(%arg0: i32) -> (i32, i32) {
    %c0_i32 = arith.constant 0 : i32
    %c0_i32_0 = arith.constant 0 : i32
    %c0_i32_1 = arith.constant 0 : i32
    return %c0_i32, %c0_i32_0 : i32, i32
  }
  func.func @transform_3(%arg0: i32) -> (i32, i32) {
    %c0_i32 = arith.constant 0 : i32
    %c0_i32_0 = arith.constant 0 : i32
    %c0_i32_1 = arith.constant 0 : i32
    return %c0_i32, %c0_i32_0 : i32, i32
  }
  func.func @transform_4(%arg0: i32) -> (i32, i32) {
    %c0_i32 = arith.constant 0 : i32
    %c0_i32_0 = arith.constant 0 : i32
    %c0_i32_1 = arith.constant 0 : i32
    return %c0_i32, %c0_i32_0 : i32, i32
  }
  func.func @transform_5(%arg0: i32) -> (i32, i32) {
    %c0_i32 = arith.constant 0 : i32
    %c0_i32_0 = arith.constant 0 : i32
    %c0_i32_1 = arith.constant 0 : i32
    return %c0_i32, %c0_i32_0 : i32, i32
  }
  func.func @transform_6(%arg0: i32) -> (i32, i32) {
    %c0_i32 = arith.constant 0 : i32
    %c0_i32_0 = arith.constant 0 : i32
    return %arg0, %c0_i32 : i32, i32
  }
}

</mosaic_0001>

<bundles_post_ra>
// kernel: tpu_custom_call.1
= control target key start
LH: loop header
LB: loop body
LE: loop exit
PB: predicated region body
PF: predicated region fallthrough
CT: control target
= control target key end

     0   :  { %11 = vsyncpa [#allocation3], 0  ;;  %s1735_s0 = inlined_call_operand.hbm [shape: f32[8,44], index: 0, kind: input, shape index: {}]   ;;  %s1736_s1 = inlined_call_operand.hbm [shape: bf16[44,512], index: 1, kind: input, shape index: {}]   ;;  %s1737_s2 = inlined_call_operand.hbm [shape: bf16[512,256], index: 2, kind: input, shape index: {}]   ;;  %s1738_s3 = inlined_call_operand.hbm [shape: bf16[256,128], index: 3, kind: input, shape index: {}]   ;;  %s1739_s4 = inlined_call_operand.hbm [shape: bf16[128,128], index: 4, kind: input, shape index: {}]   ;;  %s1740_s5 = inlined_call_operand.vmem [shape: f32[1,1024], index: 5, kind: input, shape index: {}]   ;;  %s1741_s6 = inlined_call_operand.hbm [shape: bf16[8,128], index: 6, kind: output, shape index: {}]  }
   0x1   :  { %12 = vsyncpa [#allocation6], 0 }
   0x2   :  { %13 = vsyncpa [#allocation9], 0 }
   0x3   :  { %14 = vsyncpa [#allocation4], 0  ;;  %s1560_s21 = smov [#allocation5]   ;;  %s1420_s25 = scalar_lea.hbm %s1736_s1, 1536 }
   0x4   :  { %s30_s22 = sshll.u32 %s1560_s21, 4  ;;  %p1421_p0 = scmp.ne.s32.totalorder %s1736_s1, %s1420_s25  ;;  %s31_s22 = int_to_ptr.vmem [resolvable:$true] %s30_s22 }
   0x5   :  { %p1424_p1 = scmp.lt.u32.totalorder %s1420_s25, %s1736_s1 }
   0x7   :  { %p1426_p2 = pnand %p1424_p1, %p1421_p0 }
   0x9   :  { %1429 = shalt.err (!%p1426_p2)
}
   0xa   :  { %s1430_s30 = scalar_lea.vmem %s31_s22, 1536  ;;  %p1435_p4 = scmp.lt.s32.totalorder %s31_s22, %s31_s22 }
   0xb   :  { %p1431_p3 = scmp.ne.s32.totalorder %s31_s22, %s1430_s30  ;;  %p1436_p5 = scmp.lt.s32.totalorder %s1430_s30, %s1430_s30 }
   0xd   :  { %p1437_p6 = por %p1436_p5, %p1435_p4 }
   0xf   :  { %p1438_p7 = pnand %p1437_p6, %p1431_p3 }
  0x11   :  { %1441 = shalt.err (!%p1438_p7)
}
  0x12   :  { %s1561_s7 = smov 256   ;;  %s1562_s8 = smov 16  }
  0x13   :  { %36 = dma.hbm_to_vmem [thread:$0]  %s1736_s1, 1536, %s31_s22, [#allocation6], %s1561_s7, %s1561_s7, %s1562_s8  }
  0x14   :  { %s1563_s11 = smov [#allocation8]   ;;  %s1442_s15 = scalar_lea.hbm %s1738_s3, 2048 }
  0x15   :  { %s54_s12 = sshll.u32 %s1563_s11, 4  ;;  %p1443_p8 = scmp.ne.s32.totalorder %s1738_s3, %s1442_s15  ;;  %s55_s12 = int_to_ptr.vmem [resolvable:$true] %s54_s12 }
  0x16   :  { %p1446_p9 = scmp.lt.u32.totalorder %s1442_s15, %s1738_s3 }
  0x18   :  { %p1448_p10 = pnand %p1446_p9, %p1443_p8 }
  0x1a   :  { %1451 = shalt.err (!%p1448_p10)
}
  0x1b   :  { %s1452_s20 = scalar_lea.vmem %s55_s12, 2048  ;;  %p1457_p12 = scmp.lt.s32.totalorder %s55_s12, %s55_s12 }
  0x1c   :  { %p1453_p11 = scmp.ne.s32.totalorder %s55_s12, %s1452_s20  ;;  %p1458_p13 = scmp.lt.s32.totalorder %s1452_s20, %s1452_s20 }
  0x1e   :  { %p1459_p0 = por %p1458_p13, %p1457_p12 }
  0x20   :  { %p1460_p1 = pnand %p1459_p0, %p1453_p11 }
  0x22   :  { %1463 = shalt.err (!%p1460_p1)
}
  0x23   :  { %s1564_s1 = smov 64   ;;  %s1565_s21 = smov 4  }
  0x24   :  { %60 = dma.hbm_to_vmem [thread:$0]  %s1738_s3, 2048, %s55_s12, [#allocation9], %s1564_s1, %s1564_s1, %s1565_s21  }
  0x25   :  { %s1566_s24 = smov [#allocation2]   ;;  %s1567_s26 = smov [#allocation7]  }
  0x26   :  { %s21_s25 = sshll.u32 %s1566_s24, 4  ;;  %s42_s27 = sshll.u32 %s1567_s26, 4  ;;  %s22_s25 = int_to_ptr.vmem [resolvable:$true] %s21_s25  ;;  %s1637_s27 = int_to_ptr.vmem [resolvable:$true] %s42_s27 }
  0x27   :  { %s1464_s30 = scalar_lea.hbm %s1735_s0, 128 }
  0x28   :  { %p1465_p2 = scmp.ne.s32.totalorder %s1735_s0, %s1464_s30  ;;  %p1468_p3 = scmp.lt.u32.totalorder %s1464_s30, %s1735_s0 }
  0x2a   :  { %p1470_p4 = pnand %p1468_p3, %p1465_p2 }
  0x2c   :  { %1473 = shalt.err (!%p1470_p4)
}
  0x2d   :  { %s1474_s3 = scalar_lea.vmem %s22_s25, 128  ;;  %p1479_p6 = scmp.lt.s32.totalorder %s22_s25, %s22_s25 }
  0x2e   :  { %p1475_p5 = scmp.ne.s32.totalorder %s22_s25, %s1474_s3  ;;  %p1480_p7 = scmp.lt.s32.totalorder %s1474_s3, %s1474_s3 }
  0x30   :  { %p1481_p8 = por %p1480_p7, %p1479_p6 }
  0x32   :  { %p1482_p9 = pnand %p1481_p8, %p1475_p5 }
  0x34   :  { %1485 = shalt.err (!%p1482_p9)
}
  0x35   :  { %24 = dma.hbm_to_vmem [thread:$0]  %s1735_s0, 128, %s22_s25, [#allocation3]  }
  0x36   :  { %s1486_s15 = scalar_lea.hbm %s1737_s2, 8192 }
  0x37   :  { %p1487_p10 = scmp.ne.s32.totalorder %s1737_s2, %s1486_s15  ;;  %p1490_p11 = scmp.lt.u32.totalorder %s1486_s15, %s1737_s2 }
  0x39   :  { %p1492_p12 = pnand %p1490_p11, %p1487_p10 }
  0x3b   :  { %1495 = shalt.err (!%p1492_p12)
}
  0x3c   :  { %s1496_s20 = scalar_lea.vmem %s1637_s27, 8192  ;;  %p1501_p0 = scmp.lt.s32.totalorder %s1637_s27, %s1637_s27 }
  0x3d   :  { %p1497_p13 = scmp.ne.s32.totalorder %s1637_s27, %s1496_s20  ;;  %p1502_p1 = scmp.lt.s32.totalorder %s1496_s20, %s1496_s20 }
  0x3f   :  { %p1503_p2 = por %p1502_p1, %p1501_p0 }
  0x41   :  { %p1504_p3 = pnand %p1503_p2, %p1497_p13 }
  0x43   :  { %1507 = shalt.err (!%p1504_p3)
}
  0x44   :  { %s1568_s0 = smov 128   ;;  %s1569_s22 = smov 8  }
  0x45   :  { %48 = dma.hbm_to_vmem [thread:$0]  %s1737_s2, 8192, %s1637_s27, [#allocation6], %s1568_s0, %s1568_s0, %s1569_s22  }
  0x46   :  { %s1570_s25 = smov [#allocation10]   ;;  %s1508_s30 = scalar_lea.hbm %s1739_s4, 1024 }
  0x47   :  { %s66_s26 = sshll.u32 %s1570_s25, 4  ;;  %p1509_p4 = scmp.ne.s32.totalorder %s1739_s4, %s1508_s30  ;;  %s67_s26 = int_to_ptr.vmem [resolvable:$true] %s66_s26 }
  0x48   :  { %p1512_p5 = scmp.lt.u32.totalorder %s1508_s30, %s1739_s4 }
  0x4a   :  { %p1514_p6 = pnand %p1512_p5, %p1509_p4 }
  0x4c   :  { %1517 = shalt.err (!%p1514_p6)
}
  0x4d   :  { %s1518_s3 = scalar_lea.vmem %s67_s26, 1024  ;;  %p1523_p8 = scmp.lt.s32.totalorder %s67_s26, %s67_s26 }
  0x4e   :  { %p1519_p7 = scmp.ne.s32.totalorder %s67_s26, %s1518_s3  ;;  %p1524_p9 = scmp.lt.s32.totalorder %s1518_s3, %s1518_s3 }
  0x50   :  { %p1525_p10 = por %p1524_p9, %p1523_p8 }
  0x52   :  { %p1526_p11 = pnand %p1525_p10, %p1519_p7 }
  0x54   :  { %1529 = shalt.err (!%p1526_p11)
}
  0x55   :  { %72 = dma.hbm_to_vmem [thread:$0]  %s1739_s4, 1024, %s67_s26, [#allocation9], %s1564_s1, %s1564_s1, %s1565_s21  }
  0x56   :  { %1552 = dma.done.wait [#allocation3], 128  }
  0x57   :  { %1553 = vsyncadd [#allocation3], 4294967168 }
  0x58   :  { %1554 = dma.done.wait [#allocation6], 9728  }
  0x59   :  { %1555 = vsyncadd [#allocation6], 4294957568 }
  0x5a   :  { %1556 = dma.done.wait [#allocation9], 3072  }
  0x5b   :  { %1557 = vsyncadd [#allocation9], 4294964224  ;;  %v1571_v0 = vmov 0   ;;  %v1278_v1 = vld [vmem:[#allocation5 + $0x4] ss:$16 sps:$4 sm:$0xff]   ;;  %vm187_vm0 = vcmask 1045504   ;;  %v107_v62 = vlaneseq }
  0x5c   :  { %232 = vmatprep.mubr.bf16.mxu1 %v1571_v0  ;;  %v1280_v2 = vld [vmem:[#allocation5] ss:$16 sps:$4 sm:$0xff]   ;;  %200 = vmatprep.subr.bf16.mxu1 %v1278_v1  ;;  %v1281_v3 = vld [vmem:[#allocation5 + $0x24] ss:$16 sps:$4 sm:$0xff]   ;;  %v91_v7 = vld [vmem:[#allocation2] sm:$0xff]  ;;  %vm183_vm1 = vcmask 359424  }
  0x5d   :  { %v1283_v4 = vld [vmem:[#allocation5 + $0x20] ss:$16 sps:$4 sm:$0xff]   ;;  %201 = vmatpush1.bf16.msra.mxu1 %v1280_v2  ;;  %v1284_v5 = vld [vmem:[#allocation5 + $0x44] ss:$16 sps:$4 sm:$0x3f]   ;;  %v92_v12 = vpack.c.bf16 %v91_v7, %v91_v7  ;;  %v1394_v52 = vld [vmem:[#allocation8 + $0x48] sm:$0xff]  }
  0x5e   :  { %202 = vmatprep.subr.bf16.mxu1 %v1281_v3  ;;  %v1286_v6 = vld [vmem:[#allocation5 + $0x40] ss:$16 sps:$4 sm:$0x3f]   ;;  %v1289_v9 = vld [vmem:[#allocation5 + $0xc] ss:$16 sps:$4 sm:$0xff]   ;;  %v1690_v63 = vshrl.u32 %v107_v62, 7 }
  0x5f   :  { %v189_v8 = vsel %vm187_vm0, %v1286_v6, 0  ;;  %v1296_v10 = vld [vmem:[#allocation7 + $0x4] ss:$8 sps:$4 sm:$0xff]   ;;  %v1298_v11 = vld [vmem:[#allocation7] ss:$8 sps:$4 sm:$0xff]   ;;  %v1396_v54 = vld [vmem:[#allocation8 + $0x50] sm:$0xff]  }
  0x60   :  { %v1287_v13 = vld [vmem:[#allocation5 + $0x8] ss:$16 sps:$4 sm:$0xff]   ;;  %v1299_v14 = vld [vmem:[#allocation7 + $0x14] ss:$8 sps:$4 sm:$0xff]   ;;  %686 = vmatprep.subr.bf16.mxu0 %v1296_v10  ;;  %v1302_v17 = vld [vmem:[#allocation7 + $0x24] ss:$8 sps:$4 sm:$0xff]  }
  0x61   :  { %203 = vmatpush1.bf16.msra.mxu1 %v1283_v4  ;;  %v1292_v15 = vld [vmem:[#allocation5 + $0x2c] ss:$16 sps:$4 sm:$0xff]   ;;  %687 = vmatpush1.bf16.msra.mxu0 %v1298_v11  ;;  %v1301_v16 = vld [vmem:[#allocation7 + $0x10] ss:$8 sps:$4 sm:$0xff]   ;;  %v1304_v21 = vld [vmem:[#allocation7 + $0x20] ss:$8 sps:$4 sm:$0xff]  }
  0x62   :  { %1112 = vmatprep.subr.msk.bf16.mxu1 %vm187_vm0, %v1284_v5  ;;  %688 = vmatprep.subr.bf16.mxu0 %v1299_v14  ;;  %v1290_v18 = vld [vmem:[#allocation5 + $0x28] ss:$16 sps:$4 sm:$0xff]   ;;  %v1293_v19 = vld [vmem:[#allocation5 + $0x4c] ss:$16 sps:$4 sm:$0x3f]   ;;  %v1392_v50 = vld [vmem:[#allocation8 + $0x40] sm:$0xff]  }
  0x63   :  { %v1295_v20 = vld [vmem:[#allocation5 + $0x48] ss:$16 sps:$4 sm:$0x3f]   ;;  %v1305_v22 = vld [vmem:[#allocation7 + $0x34] ss:$8 sps:$4 sm:$0xff]   ;;  %v1393_v51 = vld [vmem:[#allocation8] sm:$0xff]  }
  0x64   :  { %v195_v23 = vsel %vm187_vm0, %v1295_v20, 0  ;;  %v1307_v24 = vld [vmem:[#allocation7 + $0x30] ss:$8 sps:$4 sm:$0xff]   ;;  %v1308_v25 = vld [vmem:[#allocation7 + $0x44] ss:$8 sps:$4 sm:$0xff]   ;;  %v113_v2 = vsub.s32 1, %v1690_v63 }
  0x65   :  { %205 = vmatpush1.bf16.msra.mxu1 %v189_v8  ;;  %689 = vmatpush1.bf16.msra.mxu0 %v1301_v16  ;;  %v1310_v26 = vld [vmem:[#allocation7 + $0x40] ss:$8 sps:$4 sm:$0xff]   ;;  %v1311_v27 = vld [vmem:[#allocation7 + $0x54] ss:$8 sps:$4 sm:$0xff]   ;;  %v1313_v28 = vld [vmem:[#allocation7 + $0x50] ss:$8 sps:$4 sm:$0xff]  }
  0x66   :  { %241 = vmatprep.subr.bf16.mxu1 %v1289_v9  ;;  %690 = vmatprep.subr.bf16.mxu0 %v1302_v17  ;;  %v1314_v29 = vld [vmem:[#allocation7 + $0x64] ss:$8 sps:$4 sm:$0xff]   ;;  %v1316_v30 = vld [vmem:[#allocation7 + $0x60] ss:$8 sps:$4 sm:$0xff]   ;;  %v1317_v31 = vld [vmem:[#allocation7 + $0x74] ss:$8 sps:$4 sm:$0xff]  }
  0x67   :  { %v1319_v32 = vld [vmem:[#allocation7 + $0x70] ss:$8 sps:$4 sm:$0xff]   ;;  %v1320_v33 = vld [vmem:[#allocation7 + $0x84] ss:$8 sps:$4 sm:$0xff]   ;;  %v1322_v34 = vld [vmem:[#allocation7 + $0x80] ss:$8 sps:$4 sm:$0xff]  }
  0x68   :  { %1113 = vmatmul.mubr.msk.bf16.vlgmr.msra.gmra.mrb[0].mxu1 %vm183_vm1, %v92_v12  ;;  %v1323_v35 = vld [vmem:[#allocation7 + $0x94] ss:$8 sps:$4 sm:$0xff]   ;;  %v1325_v36 = vld [vmem:[#allocation7 + $0x90] ss:$8 sps:$4 sm:$0xff]   ;;  %v1326_v37 = vld [vmem:[#allocation7 + $0xa4] ss:$8 sps:$4 sm:$0xff]  }
  0x69   :  { %242 = vmatpush1.bf16.msra.mxu1 %v1287_v13  ;;  %273 = vmatprep.mubr.bf16.mxu1 %v1571_v0  ;;  %v1328_v38 = vld [vmem:[#allocation7 + $0xa0] ss:$8 sps:$4 sm:$0xff]   ;;  %v1329_v39 = vld [vmem:[#allocation7 + $0xb4] ss:$8 sps:$4 sm:$0xff]   ;;  %v1331_v40 = vld [vmem:[#allocation7 + $0xb0] ss:$8 sps:$4 sm:$0xff]  }
  0x6a   :  { %243 = vmatprep.subr.bf16.mxu1 %v1292_v15  ;;  %691 = vmatpush1.bf16.msra.mxu0 %v1304_v21  ;;  %v1332_v41 = vld [vmem:[#allocation7 + $0xc4] ss:$8 sps:$4 sm:$0xff]   ;;  %v1334_v42 = vld [vmem:[#allocation7 + $0xc0] ss:$8 sps:$4 sm:$0xff]   ;;  %v1335_v43 = vld [vmem:[#allocation7 + $0xd4] ss:$8 sps:$4 sm:$0xff]  }
  0x6b   :  { %692 = vmatprep.subr.bf16.mxu0 %v1305_v22  ;;  %v1337_v44 = vld [vmem:[#allocation7 + $0xd0] ss:$8 sps:$4 sm:$0xff]   ;;  %v1338_v45 = vld [vmem:[#allocation7 + $0xe4] ss:$8 sps:$4 sm:$0xff]   ;;  %v1340_v46 = vld [vmem:[#allocation7 + $0xe0] ss:$8 sps:$4 sm:$0xff]  }
  0x6c   :  { %v1341_v47 = vld [vmem:[#allocation7 + $0xf4] ss:$8 sps:$4 sm:$0xff]   ;;  %v1343_v48 = vld [vmem:[#allocation7 + $0xf0] ss:$8 sps:$4 sm:$0xff]   ;;  %v1346_v49 = vld [vmem:[#allocation7 + $0x104] ss:$8 sps:$4 sm:$0xff]  }
  0x6d   :  { %244 = vmatpush1.bf16.msra.mxu1 %v1290_v18  ;;  %v1395_v53 = vld [vmem:[#allocation8 + $0x8] sm:$0xff]   ;;  %v1397_v55 = vld [vmem:[#allocation8 + $0x10] sm:$0xff]   ;;  %v1398_v56 = vld [vmem:[#allocation8 + $0x58] sm:$0xff]   ;;  %v109_v0 = vsub.s32 0, %v1690_v63  ;;  %v121_v15 = vsub.s32 3, %v1690_v63  ;;  %vm1573_vm2 = vmmov 0  }
  0x6e   :  { %1114 = vmatprep.subr.msk.bf16.mxu1 %vm187_vm0, %v1293_v19  ;;  %693 = vmatpush1.bf16.msra.mxu0 %v1307_v24  ;;  %v1399_v57 = vld [vmem:[#allocation8 + $0x18] sm:$0xff]   ;;  %v1400_v58 = vld [vmem:[#allocation8 + $0x60] sm:$0xff]   ;;  %v1402_v60 = vld [vmem:[#allocation8 + $0x68] sm:$0xff]  }
  0x6f   :  { %694 = vmatprep.subr.bf16.mxu0 %v1308_v25  ;;  %v1401_v59 = vld [vmem:[#allocation8 + $0x20] sm:$0xff]   ;;  %v1403_v61 = vld [vmem:[#allocation8 + $0x28] sm:$0xff]   ;;  %v1696_v1 = vld [vmem:[%s1740_s5] sm:$0xf] }
  0x70   :  { %v110_v3 = vrot.slane %v1696_v1, %v109_v0  ;;  %v114_v4 = vrot.slane %v1696_v1, %v113_v2  ;;  %v1344_v14 = vld [vmem:[#allocation7 + $0x100] ss:$8 sps:$4 sm:$0xff]   ;;  %v1349_v17 = vld [vmem:[#allocation7 + $0x114] ss:$8 sps:$4 sm:$0xff]   ;;  %v1347_v18 = vld [vmem:[#allocation7 + $0x110] ss:$8 sps:$4 sm:$0xff]   ;;  %v122_v19 = vrot.slane %v1696_v1, %v121_v15 }
  0x71   :  { %246 = vmatpush1.bf16.msra.mxu1 %v195_v23  ;;  %v1352_v20 = vld [vmem:[#allocation7 + $0x124] ss:$8 sps:$4 sm:$0xff]   ;;  %v1350_v23 = vld [vmem:[#allocation7 + $0x120] ss:$8 sps:$4 sm:$0xff]  }
  0x72   :  { %695 = vmatpush1.bf16.msra.mxu0 %v1310_v26  ;;  %1206 = vmatprep.subr.bf16.mxu1 %v1392_v50  ;;  %v1355_v26 = vld [vmem:[#allocation7 + $0x134] ss:$8 sps:$4 sm:$0xff]  }
  0x73   :  { %696 = vmatprep.subr.bf16.mxu0 %v1311_v27  ;;  %v1385_v50 = vld [vmem:[#allocation7 + $0x1d4] ss:$8 sps:$4 sm:$0xff]  }
  0x74   :  { %1115 = vmatmul.mubr.msk.bf16.vlgmr.msra.gmra.mrb[4].mxu1 %vm183_vm1, %v92_v12 }
  0x75   :  { %1207 = vmatpush3.bf16.msra.mxu1 %v1393_v51  ;;  %v1383_v51 = vld [vmem:[#allocation7 + $0x1d0] ss:$8 sps:$4 sm:$0xff]  }
  0x76   :  { %697 = vmatpush1.bf16.msra.mxu0 %v1313_v28  ;;  %1208 = vmatprep.subr.bf16.mxu1 %v1394_v52 }
  0x77   :  { %698 = vmatprep.subr.bf16.mxu0 %v1314_v29  ;;  %v1353_v29 = vld [vmem:[#allocation7 + $0x130] ss:$8 sps:$4 sm:$0xff]  }
  0x79   :  { %1209 = vmatpush3.bf16.msra.mxu1 %v1395_v53  ;;  %v1388_v53 = vld [vmem:[#allocation7 + $0x1e4] ss:$8 sps:$4 sm:$0xff]  }
  0x7a   :  { %699 = vmatpush1.bf16.msra.mxu0 %v1316_v30  ;;  %1210 = vmatprep.subr.bf16.mxu1 %v1396_v54  ;;  %v1386_v54 = vld [vmem:[#allocation7 + $0x1e0] ss:$8 sps:$4 sm:$0xff]  }
  0x7b   :  { %700 = vmatprep.subr.bf16.mxu0 %v1317_v31  ;;  %v1358_v31 = vld [vmem:[#allocation7 + $0x144] ss:$8 sps:$4 sm:$0xff]  }
  0x7d   :  { %1211 = vmatpush3.bf16.msra.mxu1 %v1397_v55 }
  0x7e   :  { %701 = vmatpush1.bf16.msra.mxu0 %v1319_v32  ;;  %1212 = vmatprep.subr.bf16.mxu1 %v1398_v56  ;;  %v1356_v32 = vld [vmem:[#allocation7 + $0x140] ss:$8 sps:$4 sm:$0xff]   ;;  %v1391_v56 = vld [vmem:[#allocation7 + $0x1f4] ss:$8 sps:$4 sm:$0xff]  }
  0x7f   :  { %702 = vmatprep.subr.bf16.mxu0 %v1320_v33  ;;  %v1361_v33 = vld [vmem:[#allocation7 + $0x154] ss:$8 sps:$4 sm:$0xff]  }
  0x81   :  { %1213 = vmatpush3.bf16.msra.mxu1 %v1399_v57  ;;  %v1389_v57 = vld [vmem:[#allocation7 + $0x1f0] ss:$8 sps:$4 sm:$0xff]  }
  0x82   :  { %703 = vmatpush1.bf16.msra.mxu0 %v1322_v34  ;;  %1214 = vmatprep.subr.bf16.mxu1 %v1400_v58  ;;  %v1359_v34 = vld [vmem:[#allocation7 + $0x150] ss:$8 sps:$4 sm:$0xff]  }
  0x83   :  { %704 = vmatprep.subr.bf16.mxu0 %v1323_v35  ;;  %v1364_v35 = vld [vmem:[#allocation7 + $0x164] ss:$8 sps:$4 sm:$0xff]  }
  0x85   :  { %1215 = vmatpush3.bf16.msra.mxu1 %v1401_v59 }
  0x86   :  { %705 = vmatpush1.bf16.msra.mxu0 %v1325_v36  ;;  %1216 = vmatprep.subr.bf16.mxu1 %v1402_v60  ;;  %v1362_v36 = vld [vmem:[#allocation7 + $0x160] ss:$8 sps:$4 sm:$0xff]   ;;  %v1404_v60 = vld [vmem:[#allocation8 + $0x70] sm:$0xff]  }
  0x87   :  { %706 = vmatprep.subr.bf16.mxu0 %v1326_v37  ;;  %v1367_v37 = vld [vmem:[#allocation7 + $0x174] ss:$8 sps:$4 sm:$0xff]  }
  0x89   :  { %1217 = vmatpush3.bf16.msra.mxu1 %v1403_v61  ;;  %v1405_v61 = vld [vmem:[#allocation8 + $0x30] sm:$0xff]  }
  0x8a   :  { %707 = vmatpush1.bf16.msra.mxu0 %v1328_v38  ;;  %v1365_v38 = vld [vmem:[#allocation7 + $0x170] ss:$8 sps:$4 sm:$0xff]   ;;  %1218 = vmatprep.subr.bf16.mxu1 %v1404_v60 }
  0x8b   :  { %708 = vmatprep.subr.bf16.mxu0 %v1329_v39  ;;  %v1370_v39 = vld [vmem:[#allocation7 + $0x184] ss:$8 sps:$4 sm:$0xff]  }
  0x8d   :  { %1219 = vmatpush3.bf16.msra.mxu1 %v1405_v61 }
  0x8e   :  { %709 = vmatpush1.bf16.msra.mxu0 %v1331_v40  ;;  %v1368_v40 = vld [vmem:[#allocation7 + $0x180] ss:$8 sps:$4 sm:$0xff]  }
  0x8f   :  { %710 = vmatprep.subr.bf16.mxu0 %v1332_v41  ;;  %v1373_v41 = vld [vmem:[#allocation7 + $0x194] ss:$8 sps:$4 sm:$0xff]  }
  0x92   :  { %711 = vmatpush1.bf16.msra.mxu0 %v1334_v42  ;;  %v1371_v42 = vld [vmem:[#allocation7 + $0x190] ss:$8 sps:$4 sm:$0xff]  }
  0x93   :  { %712 = vmatprep.subr.bf16.mxu0 %v1335_v43  ;;  %v1376_v43 = vld [vmem:[#allocation7 + $0x1a4] ss:$8 sps:$4 sm:$0xff]  }
  0x96   :  { %713 = vmatpush1.bf16.msra.mxu0 %v1337_v44  ;;  %v1374_v44 = vld [vmem:[#allocation7 + $0x1a0] ss:$8 sps:$4 sm:$0xff]  }
  0x97   :  { %714 = vmatprep.subr.bf16.mxu0 %v1338_v45  ;;  %v1379_v45 = vld [vmem:[#allocation7 + $0x1b4] ss:$8 sps:$4 sm:$0xff]  }
  0x9a   :  { %715 = vmatpush1.bf16.msra.mxu0 %v1340_v46  ;;  %v1377_v46 = vld [vmem:[#allocation7 + $0x1b0] ss:$8 sps:$4 sm:$0xff]  }
  0x9b   :  { %716 = vmatprep.subr.bf16.mxu0 %v1341_v47  ;;  %v1382_v47 = vld [vmem:[#allocation7 + $0x1c4] ss:$8 sps:$4 sm:$0xff]  }
  0x9e   :  { %717 = vmatpush1.bf16.msra.mxu0 %v1343_v48  ;;  %v1380_v48 = vld [vmem:[#allocation7 + $0x1c0] ss:$8 sps:$4 sm:$0xff]  }
  0x9f   :  { %727 = vmatprep.subr.bf16.mxu0 %v1346_v49  ;;  %v117_v49 = vsub.s32 2, %v1690_v63  ;;  %v1411_v63 = vld [vmem:[#allocation10 + $0x18] sm:$0xff]  }
  0xa1   :  { %v118_v52 = vrot.slane %v1696_v1, %v117_v49  ;;  %v1407_v1 = vld [vmem:[#allocation8 + $0x38] sm:$0xff]  }
 0x13b   :  { %v234_v5 = vpop.f32.mrb[0].mxu1 }
 0x13c   :  { %v235_v6 = vadd.f32 %v234_v5, %v110_v3  ;;  %v236_v7 = vpop.f32.mrb[1].mxu1  ;;  %v1406_v3 = vld [vmem:[#allocation8 + $0x78] sm:$0xff]  }
 0x13d   :  { %v237_v8 = vadd.f32 %v236_v7, %v114_v4  ;;  %v238_v9 = vpop.f32.mrb[2].mxu1  ;;  %1220 = vmatprep.subr.bf16.mxu1 %v1406_v3  ;;  %v1572_v4 = vmov 0.0   ;;  %v354_v5 = vld [vmem:[%s1740_s5 + $0x4] sm:$0x3] }
 0x13e   :  { %v282_v10 = vmax.f32 %v235_v6, 0.0  ;;  %v239_v11 = vpop.f32.mrb[3].mxu1  ;;  %1221 = vmatpush3.bf16.msra.mxu1 %v1407_v1  ;;  %v359_v6 = vrot.slane %v354_v5, %v109_v0  ;;  %v363_v7 = vrot.slane %v354_v5, %v113_v2  ;;  %v1410_v0 = vld [vmem:[#allocation10 + $0x10] sm:$0xff]   ;;  %v1412_v2 = vld [vmem:[#allocation10 + $0x20] sm:$0xff]  }
 0x13f   :  { %v283_v12 = vmax.f32 %v237_v8, 0.0  ;;  %1237 = vmatprep.subr.bf16.mxu1 %v1572_v4 }
 0x140   :  { %v286_v16 = vpack.c.bf16 %v282_v10, %v282_v10 }
 0x141   :  { %v287_v13 = vpack.c.bf16 %v283_v12, %v283_v12 }
 0x143   :  { %718 = vmatprep.mubr.bf16.mxu0 %v287_v13 }
 0x144   :  { %719 = vmatmul.mubr.bf16.vlgmr.msra.gmra.mrb[0].mxu0 %v286_v16 }
 0x145   :  { %728 = vmatpush1.bf16.msra.mxu0 %v1344_v14 }
 0x146   :  { %729 = vmatprep.subr.bf16.mxu0 %v1349_v17  ;;  %v1408_v17 = vld [vmem:[#allocation10] sm:$0xff]  }
 0x147   :  { %v275_v21 = vpop.f32.mrb[4].mxu1 }
 0x148   :  { %v277_v22 = vpop.f32.mrb[5].mxu1  ;;  %v276_v55 = vadd.f32 %v275_v21, %v118_v52  ;;  %v1414_v21 = vld [vmem:[#allocation10 + $0x30] sm:$0xff]  }
 0x149   :  { %730 = vmatpush1.bf16.msra.mxu0 %v1347_v18  ;;  %v278_v24 = vadd.f32 %v277_v22, %v122_v19  ;;  %v279_v25 = vpop.f32.mrb[6].mxu1  ;;  %v1409_v19 = vld [vmem:[#allocation10 + $0x8] sm:$0xff]   ;;  %v1415_v22 = vld [vmem:[#allocation10 + $0x38] sm:$0xff]  }
 0x14a   :  { %731 = vmatprep.subr.bf16.mxu0 %v1352_v20  ;;  %v280_v27 = vpop.f32.mrb[7].mxu1  ;;  %v284_v58 = vmax.f32 %v276_v55, 0.0  ;;  %v1413_v20 = vld [vmem:[#allocation10 + $0x28] sm:$0xff]  }
 0x14b   :  { %v285_v28 = vmax.f32 %v278_v24, 0.0  ;;  %v1180_v24 = vld [vmem:[%s1740_s5 + $0x6] ss:$0 sm:$0xff] }
 0x14c   :  { %v288_v59 = vpack.c.bf16 %v284_v58, %v284_v58 }
 0x14d   :  { %732 = vmatpush1.bf16.msra.mxu0 %v1350_v23  ;;  %v289_v30 = vpack.c.bf16 %v285_v28, %v285_v28 }
 0x14e   :  { %733 = vmatprep.subr.bf16.mxu0 %v1355_v26 }
 0x14f   :  { %759 = vmatprep.mubr.bf16.mxu0 %v289_v30 }
 0x151   :  { %734 = vmatpush1.bf16.msra.mxu0 %v1353_v29 }
 0x152   :  { %735 = vmatprep.subr.bf16.mxu0 %v1358_v31 }
 0x155   :  { %736 = vmatpush1.bf16.msra.mxu0 %v1356_v32  ;;  %v1197_v32 = vld [vmem:[%s1740_s5 + $0x7] ss:$0 sm:$0xff]  ;;  %s1574_s5 = smov [#allocation11]  }
 0x156   :  { %737 = vmatprep.subr.bf16.mxu0 %v1361_v33  ;;  %s1089_s16 = sshll.u32 %s1574_s5, 4  ;;  %s1090_s16 = int_to_ptr.vmem [resolvable:$true] %s1089_s16 }
 0x157   :  { %s1530_s17 = scalar_lea.vmem %s1090_s16, 64  ;;  %p1535_p13 = scmp.lt.s32.totalorder %s1090_s16, %s1090_s16 }
 0x158   :  { %p1531_p12 = scmp.ne.s32.totalorder %s1090_s16, %s1530_s17  ;;  %p1536_p0 = scmp.lt.s32.totalorder %s1530_s17, %s1530_s17 }
 0x159   :  { %738 = vmatpush1.bf16.msra.mxu0 %v1359_v34 }
 0x15a   :  { %739 = vmatprep.subr.bf16.mxu0 %v1364_v35  ;;  %p1537_p1 = por %p1536_p0, %p1535_p13 }
 0x15c   :  { %p1538_p2 = pnand %p1537_p1, %p1531_p12 }
 0x15d   :  { %740 = vmatpush1.bf16.msra.mxu0 %v1362_v36 }
 0x15e   :  { %741 = vmatprep.subr.bf16.mxu0 %v1367_v37 }
 0x161   :  { %742 = vmatpush1.bf16.msra.mxu0 %v1365_v38 }
 0x162   :  { %743 = vmatprep.subr.bf16.mxu0 %v1370_v39 }
 0x165   :  { %744 = vmatpush1.bf16.msra.mxu0 %v1368_v40 }
 0x166   :  { %745 = vmatprep.subr.bf16.mxu0 %v1373_v41 }
 0x169   :  { %746 = vmatpush1.bf16.msra.mxu0 %v1371_v42 }
 0x16a   :  { %747 = vmatprep.subr.bf16.mxu0 %v1376_v43 }
 0x16d   :  { %748 = vmatpush1.bf16.msra.mxu0 %v1374_v44 }
 0x16e   :  { %749 = vmatprep.subr.bf16.mxu0 %v1379_v45 }
 0x171   :  { %750 = vmatpush1.bf16.msra.mxu0 %v1377_v46  ;;  %v1061_v46 = vand.u32 127, %v107_v62 }
 0x172   :  { %751 = vmatprep.subr.bf16.mxu0 %v1382_v47 }
 0x173   :  { %vm1077_vm5 = vcmp.lt.s32.totalorder %v1061_v46, 2  ;;  %vm1079_vm6 = vcmp.le.s32.totalorder %v1061_v46, 2 }
 0x175   :  { %752 = vmatpush1.bf16.msra.mxu0 %v1380_v48 }
 0x176   :  { %753 = vmatprep.subr.bf16.mxu0 %v1385_v50 }
 0x179   :  { %754 = vmatpush1.bf16.msra.mxu0 %v1383_v51 }
 0x17a   :  { %755 = vmatprep.subr.bf16.mxu0 %v1388_v53 }
 0x17d   :  { %756 = vmatpush1.bf16.msra.mxu0 %v1386_v54 }
 0x17e   :  { %757 = vmatprep.subr.bf16.mxu0 %v1391_v56 }
 0x181   :  { %758 = vmatpush1.bf16.msra.mxu0 %v1389_v57 }
 0x184   :  { %760 = vmatmul.mubr.bf16.vlgmr.msra.gmra.mrb[0].mxu0 %v288_v59 }
 0x257   :  { %v761_v8 = vpop.f32.mrb[0].mxu0 }
 0x258   :  { %v1257_v9 = vadd.f32 %v761_v8, %v359_v6  ;;  %v763_v10 = vpop.f32.mrb[1].mxu0 }
 0x259   :  { %v1258_v11 = vadd.f32 %v763_v10, %v363_v7  ;;  %v765_v12 = vpop.f32.mrb[2].mxu0 }
 0x25a   :  { %v768_v13 = vmax.f32 %v1257_v9, 0.0  ;;  %v766_v14 = vpop.f32.mrb[3].mxu0 }
 0x25b   :  { %v769_v15 = vmax.f32 %v1258_v11, 0.0 }
 0x25c   :  { %v770_v18 = vpack.c.bf16 %v768_v13, %v768_v13 }
 0x25d   :  { %v771_v16 = vpack.c.bf16 %v769_v15, %v769_v15 }
 0x25f   :  { %939 = vmatprep.mubr.bf16.mxu1 %v771_v16 }
 0x260   :  { %940 = vmatmul.mubr.bf16.vlgmr.msra.gmra.mrb[8].mxu1 %v770_v18 }
 0x261   :  { %1238 = vmatpush3.bf16.msra.mxu1 %v1408_v17  ;;  %1253 = vmatprep.mubr.msk.bf16.mxu1 %vm1573_vm2, %v1572_v4 }
 0x262   :  { %1239 = vmatprep.subr.bf16.mxu1 %v1572_v4 }
 0x265   :  { %1240 = vmatpush3.bf16.msra.mxu1 %v1409_v19 }
 0x266   :  { %1241 = vmatprep.subr.bf16.mxu1 %v1572_v4 }
 0x269   :  { %1242 = vmatpush3.bf16.msra.mxu1 %v1410_v0 }
 0x26a   :  { %1243 = vmatprep.subr.bf16.mxu1 %v1572_v4 }
 0x26d   :  { %1244 = vmatpush3.bf16.msra.mxu1 %v1411_v63 }
 0x26e   :  { %1245 = vmatprep.subr.bf16.mxu1 %v1572_v4 }
 0x271   :  { %1246 = vmatpush3.bf16.msra.mxu1 %v1412_v2 }
 0x272   :  { %1247 = vmatprep.subr.bf16.mxu1 %v1572_v4 }
 0x275   :  { %1248 = vmatpush3.bf16.msra.mxu1 %v1413_v20 }
 0x276   :  { %1249 = vmatprep.subr.bf16.mxu1 %v1572_v4 }
 0x279   :  { %1250 = vmatpush3.bf16.msra.mxu1 %v1414_v21 }
 0x27a   :  { %1251 = vmatprep.subr.bf16.mxu1 %v1572_v4 }
 0x27d   :  { %1252 = vmatpush3.bf16.msra.mxu1 %v1415_v22 }
 0x333   :  { %v1222_v23 = vpop.f32.mrb[8].mxu1 }
 0x334   :  { %v1223_v25 = vpop.f32.mrb[9].mxu1 }
 0x335   :  { %v1224_v26 = vadd.f32 %v1223_v25, %v1222_v23  ;;  %v1225_v27 = vpop.f32.mrb[10].mxu1 }
 0x336   :  { %v1226_v28 = vpop.f32.mrb[11].mxu1 }
 0x337   :  { %v942_v29 = vadd.f32 %v1224_v26, %v1180_v24 }
 0x339   :  { %v947_v30 = vmax.f32 %v942_v29, 0.0 }
 0x33b   :  { %v948_v31 = vpack.c.bf16 %v947_v30, %v947_v30 }
 0x33d   :  { %1254 = vmatmul.mubr.bf16.vlgmr.msra.gmra.mrb[12].mxu1 %v948_v31 }
 0x410   :  { %v1054_v33 = vpop.f32.mrb[12].mxu1 }
 0x411   :  { %v1055_v34 = vadd.f32 %v1197_v32, %v1054_v33  ;;  %v1255_v35 = vpop.f32.mrb[13].mxu1 }
 0x412   :  { %v1057_v36 = vpop.f32.mrb[14].mxu1 }
 0x413   :  { %v1063_v37 = vmin.f32 %v1055_v34, 20.0  ;;  %v1256_v38 = vpop.f32.mrb[15].mxu1  ;;  %vm1062_vm4 = vcmp.gt.f32.partialorder %v1055_v34, 20.0 }
 0x415   :  { %v1064_v39 = vmul.f32 1.442695, %v1063_v37 }
 0x417   :  { %1416 = vpow2.f32 %v1064_v39 }
 0x421   :  { %v1417_v40 = vpop.eup %1416 }
 0x422   :  { %v1066_v41 = vadd.f32 1.0, %v1417_v40  ;;  %v1069_v42 = vmul.f32 -0.5, %v1417_v40  ;;  %v1072_v44 = vand.u32 2147483647, %v1417_v40 }
 0x424   :  { %1418 = vlog2.f32 %v1066_v41  ;;  %v1070_v43 = vadd.f32 1.0, %v1069_v42  ;;  %vm1073_vm3 = vcmp.lt.f32.partialorder %v1072_v44, 0.0004427343 }
 0x426   :  { %v1071_v48 = vmul.f32 %v1417_v40, %v1070_v43 }
 0x42e   :  { %v1419_v45 = vpop.eup %1418 }
 0x42f   :  { %v1068_v47 = vmul.f32 0.6931472, %v1419_v45 }
 0x431   :  { %v1074_v49 = vsel %vm1073_vm3, %v1071_v48, %v1068_v47 }
 0x432   :  { %v1075_v50 = vsel %vm1062_vm4, %v1055_v34, %v1074_v49 }
 0x433   :  { %v1076_v51 = vadd.f32 1.0, %v1075_v50 }
 0x435   :  { %v1078_v52 = vsel %vm1077_vm5, %v1076_v51, %v1055_v34 }
 0x436   :  { %v1080_v53 = vsel %vm1079_vm6, %v1078_v52, 0.0 }
 0x437   :  { %v1081_v54 = vpack.c.bf16 %v1080_v53, %v1080_v53 }
 0x439   :  { %1082 = vst [vmem:[#allocation11] sm:$0xf] %v1081_v54 }
 0x43a   :  { %1541 = shalt.err (!%p1538_p2)
}
 0x43b   :  { %s1542_s20 = scalar_lea.hbm %s1741_s6, 64 }
 0x43c   :  { %p1543_p3 = scmp.ne.s32.totalorder %s1741_s6, %s1542_s20  ;;  %p1546_p4 = scmp.lt.u32.totalorder %s1542_s20, %s1741_s6 }
 0x43e   :  { %p1548_p5 = pnand %p1546_p4, %p1543_p3 }
 0x440   :  { %1551 = shalt.err (!%p1548_p5)
}
 0x441   :  { %1092 = dma.vmem_to_hbm [thread:$0]  %s1090_s16, 64, %s1741_s6, [#allocation4]  }
 0x442   :  { %1558 = dma.done.wait [#allocation4], 64  }
 0x443   :  { %1559 = vsyncadd [#allocation4], 4294967232 }
 0x444   :  { %1096 = vsyncpa [#allocation3], 1 }
 0x445   :  { %1097 = vsyncpa [#allocation6], 1 }
 0x446   :  { %1098 = vsyncpa [#allocation9], 1 }
 0x447   :  { %1099 = vsyncpa [#allocation4], 1 }

</bundles_post_ra>
